<compile_context>
chip_gen: v5e
topology: v5e:2x2
jax: 0.10.0
libtpu: 0.0.40
codegen_flags: <defaults>
</compile_context>

<pallas_src>
import math

import jax
import jax.numpy as jnp
import numpy as np
from jax.experimental import pallas as pl
from jax.experimental.pallas import tpu as pltpu

EMB_DIM = 32
HIDDEN = 4 * EMB_DIM          # 128
SEQ = 8
BATCH = 2

# GELU (tanh approx) constants, folded so the gate is sigmoid(h*(A + B*h*h)):
#   0.5*h*(1 + tanh(c*(h + 0.044715*h^3))) == h * sigmoid(2c*h + 2c*0.044715*h^3)
_C = math.sqrt(2.0 / math.pi)
_A = 2.0 * _C
_B = 2.0 * _C * 0.044715


def feed_forward_kernel(xt_ref, w1_ref, b1_ref, w2_ref, b2_ref, ot_ref):
    # Feature-major: tokens on the lane axis.  xt: (D, tm) f32.
    xt = xt_ref[...]
    # Linear 1 on the MXU: bf16 operands, f32 accumulation.    h^T: (H, tm)
    h = jnp.dot(w1_ref[...], xt.astype(jnp.bfloat16),
                preferred_element_type=jnp.float32) + b1_ref[...]
    # tanh-GELU (same formula as the PyTorch module), constants folded and the
    # 0.5*(1+tanh) rewritten as a logistic (EUP); elementwise math stays f32.
    g = h * jax.nn.sigmoid(h * (_A + _B * (h * h)))
    # Linear 2 on the MXU.                                      y^T: (D, tm)
    yt = jnp.dot(w2_ref[...], g.astype(jnp.bfloat16),
                 preferred_element_type=jnp.float32) + b2_ref[...]
    ot_ref[...] = yt.astype(ot_ref.dtype)


def _choose_tile_m(M, tile_m):
    """Token-tile width along the lane (last) axis."""
    if M < 256:
        # One full-extent block: legal for any M, no padding, single grid step.
        return M
    # Multi-tile: tiles are multiples of 128 lanes, capped at tile_m, and there
    # are always >= 2 tiles so v7x can shard across both TensorCores.  A ragged
    # last tile is fine: token columns are independent and Pallas masks the
    # out-of-bounds lanes on the store.
    tm = min(tile_m, (M // 2 // 128) * 128)
    return max(tm, 128)


def feed_forward(x, w1, b1, w2, b2, *, tile_m=2048):
    """FeedForward over x of shape (..., D).

    Weights use the torch nn.Linear (out_features, in_features) layout:
      w1: (H, D), b1: (H,), w2: (D, H), b2: (D,)   with H = 4*D.
    """
    orig_shape = x.shape
    D = orig_shape[-1]
    H = w1.shape[0]
    M = int(np.prod(orig_shape[:-1]))            # flattened B*T tokens

    # Lane-dense activation layout: tokens -> lane axis.
    xt = x.reshape(M, D).T                        # (D, M)

    # bf16 MXU operands (cast once here; f32 accumulation happens in-kernel).
    w1b = w1.astype(jnp.bfloat16)                 # (H, D)
    w2b = w2.astype(jnp.bfloat16)                 # (D, H)
    b1c = b1.reshape(H, 1).astype(jnp.float32)
    b2c = b2.reshape(D, 1).astype(jnp.float32)

    tm = _choose_tile_m(M, tile_m)
    n_tiles = pl.cdiv(M, tm)

    cost = pl.CostEstimate(
        flops=4 * M * D * H,                      # two matmuls
        transcendentals=M * H,                    # one logistic per hidden elem
        bytes_accessed=2 * M * D * 4 + 2 * D * H * 2 + (H + D) * 4,
    )

    yt = pl.pallas_call(
        feed_forward_kernel,
        out_shape=jax.ShapeDtypeStruct((D, M), x.dtype),
        grid=(n_tiles,),
        in_specs=[
            pl.BlockSpec((D, tm), lambda i: (0, i)),    # x^T token tile
            pl.BlockSpec((H, D), lambda i: (0, 0)),     # W1 (resident)
            pl.BlockSpec((H, 1), lambda i: (0, 0)),     # b1 column
            pl.BlockSpec((D, H), lambda i: (0, 0)),     # W2 (resident)
            pl.BlockSpec((D, 1), lambda i: (0, 0)),     # b2 column
        ],
        out_specs=pl.BlockSpec((D, tm), lambda i: (0, i)),
        # Token tiles are independent -> "parallel": shards across both
        # TensorCores on v7x; harmless no-op on single-core v5e/v6e.
        compiler_params=pltpu.CompilerParams(dimension_semantics=("parallel",)),
        cost_estimate=cost,
    )(xt, w1b, b1c, w2b, b2c)

    return yt.T.reshape(orig_shape)


def reference(x, w1, b1, w2, b2):
    """Pure-JAX mirror of the exact PyTorch forward (f32, highest precision)."""
    hp = jax.lax.Precision.HIGHEST
    h = jnp.einsum("btd,hd->bth", x, w1, precision=hp) + b1
    g = 0.5 * h * (1.0 + jnp.tanh(_C * (h + 0.044715 * h ** 3)))
    return jnp.einsum("bth,dh->btd", g, w2, precision=hp) + b2


if __name__ == "__main__":
    key = jax.random.PRNGKey(0)
    ks = jax.random.split(key, 5)

    def init(k, shape, scale=0.1):
        return (scale * jax.random.normal(k, shape)).astype(jnp.float32)

    # torch nn.Linear layout: weight (out, in), bias (out,)
    w1 = init(ks[0], (HIDDEN, EMB_DIM))
    b1 = init(ks[1], (HIDDEN,))
    w2 = init(ks[2], (EMB_DIM, HIDDEN))
    b2 = init(ks[3], (EMB_DIM,))
    x = jax.random.normal(ks[4], (BATCH, SEQ, EMB_DIM), dtype=jnp.float32)

    out = jax.block_until_ready(feed_forward(x, w1, b1, w2, b2))
    ref = jax.block_until_ready(reference(x, w1, b1, w2, b2))

    # bf16 MXU operands (f32 accumulation) vs. the pure-f32 reference: use a
    # bf16-appropriate tolerance.
    np.testing.assert_allclose(np.asarray(out), np.asarray(ref),
                               rtol=1e-2, atol=1e-2)

    print("KERNEL_OK")
</pallas_src>

<mosaic_0001>
module attributes {stable_mosaic.version = 11 : i64} {
  func.func @feed_forward_kernel(%arg0: i32, %arg1: memref<32x16xf32, #tpu.memory_space<vmem>>, %arg2: memref<128x32xbf16, #tpu.memory_space<vmem>>, %arg3: memref<128x1xf32, #tpu.memory_space<vmem>>, %arg4: memref<32x128xbf16, #tpu.memory_space<vmem>>, %arg5: memref<32x1xf32, #tpu.memory_space<vmem>>, %arg6: memref<32x16xf32, #tpu.memory_space<vmem>>) attributes {dimension_semantics = [#tpu.dimension_semantics<parallel>], iteration_bounds = array<i64: 1>, scalar_prefetch = 0 : i64, scratch_operands = 0 : i64, tpu.core_type = #tpu.core_type<tc>, window_params = [{transform_indices = @transform_0, window_bounds = array<i64: 32, 16>}, {pipeline_mode = #tpu.pipeline_mode<synchronous>, transform_indices = @transform_1, window_bounds = array<i64: 128, 32>}, {pipeline_mode = #tpu.pipeline_mode<synchronous>, transform_indices = @transform_2, window_bounds = array<i64: 128, 1>}, {pipeline_mode = #tpu.pipeline_mode<synchronous>, transform_indices = @transform_3, window_bounds = array<i64: 32, 128>}, {pipeline_mode = #tpu.pipeline_mode<synchronous>, transform_indices = @transform_4, window_bounds = array<i64: 32, 1>}, {transform_indices = @transform_5, window_bounds = array<i64: 32, 16>}]} {
    %c0 = arith.constant 0 : index
    %c0_0 = arith.constant 0 : index
    %0 = vector.load %arg1[%c0, %c0_0] : memref<32x16xf32, #tpu.memory_space<vmem>>, vector<32x16xf32>
    %c0_1 = arith.constant 0 : index
    %c0_2 = arith.constant 0 : index
    %1 = vector.load %arg2[%c0_1, %c0_2] : memref<128x32xbf16, #tpu.memory_space<vmem>>, vector<128x32xbf16>
    %2 = arith.truncf %0 : vector<32x16xf32> to vector<32x16xbf16>
    %cst = arith.constant dense<0.000000e+00> : vector<128x16xf32>
    %3 = tpu.matmul %1, %2, %cst {dimension_numbers = #tpu.dot_dimension_numbers<[1], [0], [0], [1], [0, 0, 1, 1], [], []>} : vector<128x32xbf16>, vector<32x16xbf16>, vector<128x16xf32> -> vector<128x16xf32>
    %c0_3 = arith.constant 0 : index
    %c0_4 = arith.constant 0 : index
    %4 = vector.load %arg3[%c0_3, %c0_4] : memref<128x1xf32, #tpu.memory_space<vmem>>, vector<128x1xf32>
    %5 = vector.broadcast %4 : vector<128x1xf32> to vector<128x16xf32>
    %6 = arith.addf %3, %5 : vector<128x16xf32>
    %7 = arith.mulf %6, %6 : vector<128x16xf32>
    %cst_5 = arith.constant 0.0713548139 : f32
    %8 = vector.broadcast %cst_5 : f32 to vector<128x16xf32>
    %9 = arith.mulf %8, %7 : vector<128x16xf32>
    %cst_6 = arith.constant 1.59576917 : f32
    %10 = vector.broadcast %cst_6 : f32 to vector<128x16xf32>
    %11 = arith.addf %10, %9 : vector<128x16xf32>
    %12 = arith.mulf %6, %11 : vector<128x16xf32>
    %13 = arith.negf %12 : vector<128x16xf32>
    %14 = math.exp %13 : vector<128x16xf32>
    %cst_7 = arith.constant 1.000000e+00 : f32
    %15 = vector.broadcast %cst_7 : f32 to vector<128x16xf32>
    %16 = arith.addf %15, %14 : vector<128x16xf32>
    %17 = arith.divf %15, %16 : vector<128x16xf32>
    %18 = arith.mulf %6, %17 : vector<128x16xf32>
    %c0_8 = arith.constant 0 : index
    %c0_9 = arith.constant 0 : index
    %19 = vector.load %arg4[%c0_8, %c0_9] : memref<32x128xbf16, #tpu.memory_space<vmem>>, vector<32x128xbf16>
    %20 = arith.truncf %18 : vector<128x16xf32> to vector<128x16xbf16>
    %cst_10 = arith.constant dense<0.000000e+00> : vector<32x16xf32>
    %21 = tpu.matmul %19, %20, %cst_10 {dimension_numbers = #tpu.dot_dimension_numbers<[1], [0], [0], [1], [0, 0, 1, 1], [], []>} : vector<32x128xbf16>, vector<128x16xbf16>, vector<32x16xf32> -> vector<32x16xf32>
    %c0_11 = arith.constant 0 : index
    %c0_12 = arith.constant 0 : index
    %22 = vector.load %arg5[%c0_11, %c0_12] : memref<32x1xf32, #tpu.memory_space<vmem>>, vector<32x1xf32>
    %23 = vector.broadcast %22 : vector<32x1xf32> to vector<32x16xf32>
    %24 = arith.addf %21, %23 : vector<32x16xf32>
    %c0_13 = arith.constant 0 : index
    %c0_14 = arith.constant 0 : index
    %25 = vector.load %arg6[%c0_13, %c0_14] : memref<32x16xf32, #tpu.memory_space<vmem>>, vector<32x16xf32>
    tpu.vector_store %arg6[%c0_13, %c0_14], %24 {strides = array<i32>} : memref<32x16xf32, #tpu.memory_space<vmem>>, vector<32x16xf32>,
    return
  }
  func.func @transform_0(%arg0: i32) -> (i32, i32) {
    %c0_i32 = arith.constant 0 : i32
    %c0_i32_0 = arith.constant 0 : i32
    return %c0_i32, %arg0 : i32, i32
  }
  func.func @transform_1(%arg0: i32) -> (i32, i32) {
    %c0_i32 = arith.constant 0 : i32
    %c0_i32_0 = arith.constant 0 : i32
    %c0_i32_1 = arith.constant 0 : i32
    return %c0_i32, %c0_i32_0 : i32, i32
  }
  func.func @transform_2(%arg0: i32) -> (i32, i32) {
    %c0_i32 = arith.constant 0 : i32
    %c0_i32_0 = arith.constant 0 : i32
    %c0_i32_1 = arith.constant 0 : i32
    return %c0_i32, %c0_i32_0 : i32, i32
  }
  func.func @transform_3(%arg0: i32) -> (i32, i32) {
    %c0_i32 = arith.constant 0 : i32
    %c0_i32_0 = arith.constant 0 : i32
    %c0_i32_1 = arith.constant 0 : i32
    return %c0_i32, %c0_i32_0 : i32, i32
  }
  func.func @transform_4(%arg0: i32) -> (i32, i32) {
    %c0_i32 = arith.constant 0 : i32
    %c0_i32_0 = arith.constant 0 : i32
    %c0_i32_1 = arith.constant 0 : i32
    return %c0_i32, %c0_i32_0 : i32, i32
  }
  func.func @transform_5(%arg0: i32) -> (i32, i32) {
    %c0_i32 = arith.constant 0 : i32
    %c0_i32_0 = arith.constant 0 : i32
    return %c0_i32, %arg0 : i32, i32
  }
}

</mosaic_0001>

<bundles_post_ra>
// kernel: tpu_custom_call.1
= control target key start
LH: loop header
LB: loop body
LE: loop exit
PB: predicated region body
PF: predicated region fallthrough
CT: control target
= control target key end

     0   :  { %v867_v0 = vmov 0   ;;  %vm179_vm0 = vcmask 261120   ;;  %s1444_s2 = inlined_call_operand.vmem [shape: f32[128,1], index: 2, kind: input, shape index: {}]   ;;  %s1445_s0 = inlined_call_operand.vmem [shape: f32[32,16], index: 0, kind: input, shape index: {}]   ;;  %s1446_s1 = inlined_call_operand.vmem [shape: bf16[128,32], index: 1, kind: input, shape index: {}]   ;;  %s1447_s4 = inlined_call_operand.vmem [shape: f32[32,1], index: 4, kind: input, shape index: {}]   ;;  %s1448_s3 = inlined_call_operand.vmem [shape: bf16[32,128], index: 3, kind: input, shape index: {}]   ;;  %s1449_s5 = inlined_call_operand.vmem [shape: f32[32,16], index: 5, kind: output, shape index: {}]  }
   0x1   :  { %800 = vset.pattern.permute.xlu0 %v867_v0  ;;  %v57_v1 = vld [vmem:[%s1444_s2 + $0x70] sm:$0xff]  ;;  %801 = vset.pattern.permute.xlu1 %v867_v0  ;;  %v55_v2 = vld [vmem:[%s1444_s2 + $0x60] sm:$0xff]  ;;  %v24_v4 = vld [vmem:[%s1445_s0 + $0x18] sm:$0xff] }
   0x2   :  { %v23_v3 = vld [vmem:[%s1445_s0 + $0x10] sm:$0xff]  ;;  %131 = vperm.xlu0 %800, %v57_v1   ;;  %121 = vperm.xlu1 %801, %v55_v2   ;;  %v21_v5 = vld [vmem:[%s1445_s0] sm:$0xff]  ;;  %v22_v6 = vld [vmem:[%s1445_s0 + $0x8] sm:$0xff] }
   0x3   :  { %v42_v7 = vpack.c.bf16 %v24_v4, %v23_v3  ;;  %802 = vset.pattern.permute.xlu2 %v867_v0  ;;  %v53_v8 = vld [vmem:[%s1444_s2 + $0x50] sm:$0xff]  ;;  %v41_v9 = vpack.c.bf16 %v22_v6, %v21_v5  ;;  %v58_v10 = vld [vmem:[%s1444_s2 + $0x78] sm:$0xff]  ;;  %v777_v11 = vld [vmem:[%s1446_s1] sm:$0xff] }
   0x4   :  { %111 = vperm.xlu2 %802, %v53_v8   ;;  %v780_v12 = vld [vmem:[%s1446_s1 + $0x18] sm:$0xff]  ;;  %v56_v13 = vld [vmem:[%s1444_s2 + $0x68] sm:$0xff]  ;;  %v783_v14 = vld [vmem:[%s1446_s1 + $0x30] sm:$0xff] }
   0x5   :  { %210 = vmatpush.bf16.msra.mxu0 %v42_v7  ;;  %787 = vmatpush.bf16.msra.mxu2 %v42_v7  ;;  %v54_v15 = vld [vmem:[%s1444_s2 + $0x58] sm:$0xff]  ;;  %v51_v16 = vld [vmem:[%s1444_s2 + $0x40] sm:$0xff]  ;;  %v52_v17 = vld [vmem:[%s1444_s2 + $0x48] sm:$0xff] }
   0x6   :  { %788 = vmatpush.bf16.msra.mxu3 %v42_v7  ;;  %v49_v18 = vld [vmem:[%s1444_s2 + $0x30] sm:$0xff]  ;;  %v50_v19 = vld [vmem:[%s1444_s2 + $0x38] sm:$0xff]  ;;  %v778_v20 = vld [vmem:[%s1446_s1 + $0x8] sm:$0xff] }
   0x7   :  { %v781_v21 = vld [vmem:[%s1446_s1 + $0x20] sm:$0xff]  ;;  %v784_v23 = vld [vmem:[%s1446_s1 + $0x38] sm:$0xff]  ;;  %v48_v24 = vld [vmem:[%s1444_s2 + $0x28] sm:$0xff] }
   0x8   :  { %v47_v22 = vld [vmem:[%s1444_s2 + $0x20] sm:$0xff]  ;;  %v45_v25 = vld [vmem:[%s1444_s2 + $0x10] sm:$0xff]  ;;  %v46_v26 = vld [vmem:[%s1444_s2 + $0x18] sm:$0xff] }
   0x9   :  { %211 = vmatpush.bf16.msra.mxu0 %v41_v9  ;;  %789 = vmatpush.bf16.msra.mxu2 %v41_v9  ;;  %v43_v27 = vld [vmem:[%s1444_s2] sm:$0xff]  ;;  %v44_v28 = vld [vmem:[%s1444_s2 + $0x8] sm:$0xff]  ;;  %v779_v29 = vld [vmem:[%s1446_s1 + $0x10] sm:$0xff] }
   0xa   :  { %790 = vmatpush.bf16.msra.mxu3 %v41_v9  ;;  %136 = vperm.xlu0 %800, %v58_v10   ;;  %v782_v30 = vld [vmem:[%s1446_s1 + $0x28] sm:$0xff]  ;;  %v649_v31 = vld [vmem:[%s1447_s4] sm:$0xff]  ;;  %v651_v33 = vld [vmem:[%s1447_s4 + $0x10] sm:$0xff] }
   0xb   :  { %126 = vperm.xlu1 %801, %v56_v13   ;;  %v650_v32 = vld [vmem:[%s1447_s4 + $0x8] sm:$0xff]  ;;  %v652_v34 = vld [vmem:[%s1447_s4 + $0x18] sm:$0xff] }
   0xc   :  { %745 = vmatmul.msk.bf16.vlgmr.msra.gmra.mxu0 %vm179_vm0, %v777_v11  ;;  %748 = vmatmul.msk.bf16.vlgmr.msra.gmra.mxu2 %vm179_vm0, %v780_v12 }
   0xd   :  { %751 = vmatmul.msk.bf16.vlgmr.msra.gmra.mxu3 %vm179_vm0, %v783_v14  ;;  %116 = vperm.xlu2 %802, %v54_v15  }
  0x12   :  { %101 = vperm.xlu0 %800, %v51_v16  }
  0x13   :  { %106 = vperm.xlu1 %801, %v52_v17  }
  0x15   :  { %91 = vperm.xlu2 %802, %v49_v18  }
  0x1a   :  { %96 = vperm.xlu0 %800, %v50_v19  }
  0x1b   :  { %81 = vperm.xlu1 %801, %v47_v22  }
  0x1c   :  { %746 = vmatmul.msk.bf16.gmra.mxu0 %vm179_vm0, %v778_v20  ;;  %749 = vmatmul.msk.bf16.gmra.mxu2 %vm179_vm0, %v781_v21 }
  0x1d   :  { %752 = vmatmul.msk.bf16.gmra.mxu3 %vm179_vm0, %v784_v23  ;;  %86 = vperm.xlu2 %802, %v48_v24  }
  0x22   :  { %71 = vperm.xlu0 %800, %v45_v25  }
  0x23   :  { %76 = vperm.xlu1 %801, %v46_v26  }
  0x25   :  { %61 = vperm.xlu2 %802, %v43_v27  }
  0x2a   :  { %66 = vperm.xlu0 %800, %v44_v28  }
  0x2b   :  { %655 = vperm.xlu1 %801, %v649_v31  }
  0x2c   :  { %747 = vmatmul.msk.bf16.gmra.mxu0 %vm179_vm0, %v779_v29  ;;  %750 = vmatmul.msk.bf16.gmra.mxu2 %vm179_vm0, %v782_v30 }
  0x2d   :  { %660 = vperm.xlu2 %802, %v650_v32  }
  0x32   :  { %665 = vperm.xlu0 %800, %v651_v33  }
  0x33   :  { %670 = vperm.xlu1 %801, %v652_v34  }
  0x5e   :  { %v1002_v35 = vpop.permute.xlu2 %111 }
  0x67   :  { %v1004_v36 = vpop.permute.xlu2 %116 }
  0x6f   :  { %v92_v37 = vpop.permute.xlu2 %91 }
  0x74   :  { %v132_v38 = vpop.permute.xlu0 %131  ;;  %v122_v39 = vpop.permute.xlu1 %121 }
  0x77   :  { %v1008_v41 = vpop.permute.xlu2 %86 }
  0x7c   :  { %v1006_v40 = vpop.permute.xlu0 %136 }
  0x7d   :  { %v127_v42 = vpop.permute.xlu1 %126 }
  0x7f   :  { %v62_v44 = vpop.permute.xlu2 %61 }
  0x84   :  { %v102_v43 = vpop.permute.xlu0 %101 }
  0x85   :  { %v1014_v49 = vpop.permute.xlu1 %106 }
  0x89   :  { %v213_v45 = vpop.f32.mrf.mxu0 }
  0x8a   :  { %v1010_v46 = vadd.f32 %v213_v45, %v62_v44 }
  0x8c   :  { %v253_v47 = vmul.f32 %v1010_v46, %v1010_v46  ;;  %v97_v48 = vpop.permute.xlu0 %96 }
  0x8d   :  { %v1025_v0 = vpop.permute.xlu1 %81 }
  0x8e   :  { %v269_v50 = vmul.f32 0.071354814, %v253_v47 }
  0x8f   :  { %v228_v51 = vpop.f32.mrf.mxu2 }
  0x90   :  { %v285_v52 = vadd.f32 1.5957692, %v269_v50  ;;  %v1016_v53 = vadd.f32 %v228_v51, %v92_v37  ;;  %v243_v54 = vpop.f32.mrf.mxu3 }
  0x91   :  { %v1018_v55 = vadd.f32 %v243_v54, %v122_v39  ;;  %v215_v56 = vpop.f32.mrf.mxu0 }
  0x92   :  { %v259_v57 = vmul.f32 %v1016_v53, %v1016_v53  ;;  %v301_v59 = vmul.f32 %v285_v52, %v1010_v46 }
  0x93   :  { %v265_v58 = vmul.f32 %v1018_v55, %v1018_v55 }
  0x94   :  { %v275_v60 = vmul.f32 0.071354814, %v259_v57  ;;  %v72_v61 = vpop.permute.xlu0 %71  ;;  %v753_v3 = vmul.f32 -1.442695, %v301_v59 }
  0x95   :  { %v281_v62 = vmul.f32 0.071354814, %v265_v58  ;;  %v77_v29 = vpop.permute.xlu1 %76 }
  0x96   :  { %v291_v63 = vadd.f32 1.5957692, %v275_v60  ;;  %803 = vpow2.f32 %v753_v3 }
  0x97   :  { %v297_v1 = vadd.f32 1.5957692, %v281_v62  ;;  %v230_v2 = vpop.f32.mrf.mxu2 }
  0x98   :  { %v307_v4 = vmul.f32 %v291_v63, %v1016_v53  ;;  %v1028_v5 = vadd.f32 %v230_v2, %v97_v48  ;;  %v245_v6 = vpop.f32.mrf.mxu3 }
  0x99   :  { %v313_v7 = vmul.f32 %v297_v1, %v1018_v55  ;;  %v1031_v8 = vadd.f32 %v245_v6, %v127_v42  ;;  %v218_v9 = vpop.f32.mrf.mxu0 }
  0x9a   :  { %v260_v10 = vmul.f32 %v1028_v5, %v1028_v5  ;;  %v1035_v11 = vadd.f32 %v218_v9, %v72_v61  ;;  %v759_v12 = vmul.f32 -1.442695, %v307_v4 }
  0x9b   :  { %v765_v13 = vmul.f32 -1.442695, %v313_v7  ;;  %v266_v14 = vmul.f32 %v1031_v8, %v1031_v8 }
  0x9c   :  { %v276_v15 = vmul.f32 0.071354814, %v260_v10  ;;  %v255_v16 = vmul.f32 %v1035_v11, %v1035_v11  ;;  %v67_v17 = vpop.permute.xlu0 %66  ;;  %v804_v34 = vpop.eup %803 }
  0x9d   :  { %805 = vpow2.f32 %v765_v13  ;;  %v282_v18 = vmul.f32 0.071354814, %v266_v14  ;;  %v1041_v19 = vadd.f32 %v215_v56, %v67_v17  ;;  %v1063_v58 = vadd.f32 1.0, %v804_v34 }
  0x9e   :  { %v292_v20 = vadd.f32 1.5957692, %v276_v15  ;;  %v271_v21 = vmul.f32 0.071354814, %v255_v16  ;;  %807 = vpow2.f32 %v759_v12 }
  0x9f   :  { %v298_v22 = vadd.f32 1.5957692, %v282_v18  ;;  %v254_v23 = vmul.f32 %v1041_v19, %v1041_v19  ;;  %v233_v24 = vpop.f32.mrf.mxu2 }
  0xa0   :  { %v308_v25 = vmul.f32 %v292_v20, %v1028_v5  ;;  %v287_v26 = vadd.f32 1.5957692, %v271_v21  ;;  %v1046_v27 = vadd.f32 %v233_v24, %v102_v43  ;;  %v248_v28 = vpop.f32.mrf.mxu3 }
  0xa1   :  { %v314_v30 = vmul.f32 %v298_v22, %v1031_v8  ;;  %v270_v31 = vmul.f32 0.071354814, %v254_v23  ;;  %v1049_v32 = vadd.f32 %v248_v28, %v132_v38  ;;  %v220_v33 = vpop.f32.mrf.mxu0 }
  0xa2   :  { %v760_v37 = vmul.f32 -1.442695, %v308_v25  ;;  %v303_v39 = vmul.f32 %v287_v26, %v1035_v11  ;;  %v261_v42 = vmul.f32 %v1046_v27, %v1046_v27  ;;  %v1054_v44 = vadd.f32 %v220_v33, %v77_v29 }
  0xa3   :  { %v806_v45 = vpop.eup %805  ;;  %v766_v43 = vmul.f32 -1.442695, %v314_v30  ;;  %v286_v47 = vadd.f32 1.5957692, %v270_v31  ;;  %v267_v48 = vmul.f32 %v1049_v32, %v1049_v32 }
  0xa4   :  { %v1058_v50 = vadd.f32 1.0, %v806_v45  ;;  %809 = vpow2.f32 %v760_v37  ;;  %v755_v38 = vmul.f32 -1.442695, %v303_v39  ;;  %v277_v51 = vmul.f32 0.071354814, %v261_v42  ;;  %v808_v52 = vpop.eup %807 }
  0xa5   :  { %v302_v54 = vmul.f32 %v286_v47, %v1041_v19  ;;  %v283_v56 = vmul.f32 0.071354814, %v267_v48  ;;  %v256_v57 = vmul.f32 %v1054_v44, %v1054_v44  ;;  %v1066_v1 = vadd.f32 1.0, %v808_v52 }
  0xa6   :  { %811 = vrcp.f32 %v1058_v50  ;;  %v293_v59 = vadd.f32 1.5957692, %v277_v51  ;;  %vm566_vm2 = vweird.f32 %v1058_v50 }
  0xa7   :  { %813 = vpow2.f32 %v766_v43  ;;  %v754_v60 = vmul.f32 -1.442695, %v302_v54  ;;  %v299_v61 = vadd.f32 1.5957692, %v283_v56  ;;  %v272_v62 = vmul.f32 0.071354814, %v256_v57  ;;  %v235_v63 = vpop.f32.mrf.mxu2 }
  0xa8   :  { %815 = vpow2.f32 %v755_v38  ;;  %v309_v2 = vmul.f32 %v293_v59, %v1046_v27  ;;  %v1070_v3 = vadd.f32 %v235_v63, %v1014_v49  ;;  %v250_v4 = vpop.f32.mrf.mxu3 }
  0xa9   :  { %817 = vpow2.f32 %v754_v60  ;;  %v315_v6 = vmul.f32 %v299_v61, %v1049_v32  ;;  %v288_v7 = vadd.f32 1.5957692, %v272_v62  ;;  %v1074_v9 = vadd.f32 %v250_v4, %v1006_v40  ;;  %v223_v10 = vpop.f32.mrf.mxu0 }
  0xaa   :  { %v810_v12 = vpop.eup %809  ;;  %v761_v13 = vmul.f32 -1.442695, %v309_v2  ;;  %v262_v14 = vmul.f32 %v1070_v3, %v1070_v3  ;;  %v1079_v15 = vadd.f32 %v223_v10, %v1025_v0  ;;  %819 = vrcp.f32 %v1063_v58 }
  0xab   :  { %v767_v49 = vmul.f32 -1.442695, %v315_v6  ;;  %v304_v16 = vmul.f32 %v288_v7, %v1054_v44  ;;  %v268_v17 = vmul.f32 %v1074_v9, %v1074_v9  ;;  %v1087_v40 = vadd.f32 1.0, %v810_v12 }
  0xac   :  { %v1085_v18 = vpop.eup %811  ;;  %821 = vpow2.f32 %v761_v13  ;;  %v278_v20 = vmul.f32 0.071354814, %v262_v14  ;;  %v257_v21 = vmul.f32 %v1079_v15, %v1079_v15  ;;  %v572_v2 = vand.u32 2147483648, %v1058_v50 }
  0xad   :  { %v814_v22 = vpop.eup %813  ;;  %823 = vrcp.f32 %v1066_v1  ;;  %v756_v0 = vmul.f32 -1.442695, %v304_v16  ;;  %v284_v23 = vmul.f32 0.071354814, %v268_v17  ;;  %v562_v24 = vmul.f32 %v1085_v18, %v1058_v50 }
  0xae   :  { %v816_v25 = vpop.eup %815  ;;  %v1094_v26 = vadd.f32 1.0, %v814_v22  ;;  %825 = vpow2.f32 %v767_v49  ;;  %v294_v28 = vadd.f32 1.5957692, %v278_v20  ;;  %v273_v29 = vmul.f32 0.071354814, %v257_v21 }
  0xaf   :  { %v818_v30 = vpop.eup %817  ;;  %v1096_v31 = vadd.f32 1.0, %v816_v25  ;;  %827 = vpow2.f32 %v756_v0  ;;  %v300_v33 = vadd.f32 1.5957692, %v284_v23  ;;  %v238_v34 = vpop.f32.mrf.mxu2  ;;  %v563_v37 = vsub.f32 1.0, %v562_v24 }
  0xb0   :  { %829 = vrcp.f32 %v1087_v40  ;;  %v310_v39 = vmul.f32 %v294_v28, %v1070_v3  ;;  %v289_v42 = vadd.f32 1.5957692, %v273_v29  ;;  %v1100_v45 = vpop.eup %819  ;;  %v1103_v43 = vadd.f32 1.0, %v818_v30 }
  0xb1   :  { %831 = vrcp.f32 %v1094_v26  ;;  %v316_v47 = vmul.f32 %v300_v33, %v1074_v9  ;;  %v1107_v48 = vadd.f32 %v238_v34, %v1002_v35  ;;  %v225_v38 = vpop.f32.mrf.mxu0  ;;  %v564_v57 = vmul.f32 %v1085_v18, %v563_v37 }
  0xb2   :  { %v822_v51 = vpop.eup %821  ;;  %v762_v52 = vmul.f32 -1.442695, %v310_v39  ;;  %v305_v54 = vmul.f32 %v289_v42, %v1079_v15  ;;  %v1111_v56 = vadd.f32 %v225_v38, %v1008_v41  ;;  %833 = vrcp.f32 %v1096_v31 }
  0xb3   :  { %v1114_v59 = vpop.eup %823  ;;  %v768_v60 = vmul.f32 -1.442695, %v316_v47  ;;  %v263_v61 = vmul.f32 %v1107_v48, %v1107_v48  ;;  %v570_v35 = vand.u32 2147483647, %v1058_v50  ;;  %v1120_v63 = vadd.f32 1.0, %v822_v51 }
  0xb4   :  { %v826_v62 = vpop.eup %825  ;;  %835 = vpow2.f32 %v762_v52  ;;  %v258_v41 = vmul.f32 %v1111_v56, %v1111_v56  ;;  %v757_v7 = vmul.f32 -1.442695, %v305_v54  ;;  %v565_v14 = vadd.f32 %v1085_v18, %v564_v57 }
  0xb5   :  { %v828_v4 = vpop.eup %827  ;;  %837 = vrcp.f32 %v1103_v43  ;;  %v1126_v6 = vadd.f32 1.0, %v826_v62  ;;  %v279_v10 = vmul.f32 0.071354814, %v263_v61  ;;  %vm567_vm1 = vweird.f32 %v1085_v18 }
  0xb6   :  { %v1128_v12 = vpop.eup %829  ;;  %839 = vpow2.f32 %v768_v60  ;;  %v274_v13 = vmul.f32 0.071354814, %v258_v41  ;;  %v1137_v20 = vadd.f32 1.0, %v828_v4  ;;  %vm1145_vm3 = vmor %vm566_vm2, %vm567_vm1  ;;  %vm1149_vm4 = vcmp.eq.f32.partialorder %v570_v35, 8.507059e+37 }
  0xb7   :  { %v1132_v49 = vpop.eup %831  ;;  %841 = vrcp.f32 %v1126_v6  ;;  %v295_v16 = vadd.f32 1.5957692, %v279_v10  ;;  %v240_v17 = vpop.f32.mrf.mxu2  ;;  %v573_v50 = vor.u32 1.1754944e-38, %v572_v2  ;;  %v569_v30 = vsel %vm1145_vm3, %v1085_v18, %v565_v14 }
  0xb8   :  { %843 = vrcp.f32 %v1120_v63  ;;  %v290_v21 = vadd.f32 1.5957692, %v274_v13  ;;  %v1140_v22 = vadd.f32 %v240_v17, %v1004_v36  ;;  %v1142_v0 = vpop.eup %833  ;;  %v577_v33 = vmul.f32 %v1132_v49, %v1094_v26 }
  0xb9   :  { %845 = vpow2.f32 %v757_v7  ;;  %v311_v23 = vmul.f32 %v295_v16, %v1107_v48  ;;  %v600_v42 = vand.u32 2147483647, %v1126_v6  ;;  %v602_v47 = vand.u32 2147483648, %v1126_v6 }
  0xba   :  { %v836_v28 = vpop.eup %835  ;;  %v306_v29 = vmul.f32 %v290_v21, %v1111_v56  ;;  %v264_v36 = vmul.f32 %v1140_v22, %v1140_v22  ;;  %vm581_vm5 = vweird.f32 %v1094_v26  ;;  %847 = vrcp.f32 %v1137_v20 }
  0xbb   :  { %v1161_v34 = vpop.eup %837  ;;  %v1163_v37 = vadd.f32 1.0, %v836_v28  ;;  %v763_v39 = vmul.f32 -1.442695, %v311_v23  ;;  %vm596_vm6 = vweird.f32 %v1126_v6  ;;  %v578_v57 = vsub.f32 1.0, %v577_v33 }
  0xbc   :  { %v840_v38 = vpop.eup %839  ;;  %v758_v51 = vmul.f32 -1.442695, %v306_v29  ;;  %v280_v52 = vmul.f32 0.071354814, %v264_v36  ;;  %v585_v60 = vand.u32 2147483647, %v1094_v26  ;;  %v574_v41 = vsel %vm1149_vm4, %v573_v50, %v569_v30 }
  0xbd   :  { %v842_v18 = vpop.eup %841  ;;  %849 = vrcp.f32 %v1163_v37  ;;  %v1171_v54 = vadd.f32 1.0, %v840_v38  ;;  %vm1180_vm7 = vcmp.eq.f32.partialorder %v600_v42, 8.507059e+37  ;;  %v603_v7 = vor.u32 1.1754944e-38, %v602_v47 }
  0xbe   :  { %v1174_v61 = vpop.eup %843  ;;  %851 = vpow2.f32 %v763_v39  ;;  %v296_v35 = vadd.f32 1.5957692, %v280_v52  ;;  %v592_v62 = vmul.f32 %v842_v18, %v1126_v6  ;;  %v587_v10 = vand.u32 2147483648, %v1094_v26 }
  0xbf   :  { %v846_v2 = vpop.eup %845  ;;  %853 = vrcp.f32 %v1171_v54  ;;  %v579_v17 = vmul.f32 %v1132_v49, %v578_v57  ;;  %vm582_vm8 = vweird.f32 %v1132_v49  ;;  %vm1190_vm9 = vcmp.eq.f32.partialorder %v585_v60, 8.507059e+37 }
  0xc0   :  { %v1185_v13 = vadd.f32 1.0, %v846_v2  ;;  %855 = vpow2.f32 %v758_v51  ;;  %v312_v14 = vmul.f32 %v296_v35, %v1140_v22  ;;  %v593_v16 = vsub.f32 1.0, %v592_v62  ;;  %v1195_v24 = vpop.eup %847  ;;  %vm583_vm12 = vmor %vm581_vm5, %vm582_vm8 }
  0xc1   :  { %v633_v23 = vmul.f32 %v574_v41, %v1018_v55  ;;  %vm597_vm10 = vweird.f32 %v842_v18  ;;  %v502_v28 = vmul.f32 %v1174_v61, %v1120_v63  ;;  %v615_v36 = vand.u32 2147483647, %v1171_v54 }
  0xc2   :  { %v764_v25 = vmul.f32 -1.442695, %v312_v14  ;;  %v594_v50 = vmul.f32 %v842_v18, %v593_v16  ;;  %857 = vrcp.f32 %v1185_v13  ;;  %v617_v30 = vand.u32 2147483648, %v1171_v54  ;;  %vm598_vm13 = vmor %vm596_vm6, %vm597_vm10 }
  0xc3   :  { %v1199_v29 = vpop.eup %849  ;;  %v580_v33 = vadd.f32 %v1132_v49, %v579_v17  ;;  %vm611_vm11 = vweird.f32 %v1171_v54  ;;  %v588_v42 = vor.u32 1.1754944e-38, %v587_v10  ;;  %v503_v52 = vsub.f32 1.0, %v502_v28 }
  0xc4   :  { %v852_v39 = vpop.eup %851  ;;  %859 = vpow2.f32 %v764_v25  ;;  %v595_v55 = vadd.f32 %v842_v18, %v594_v50  ;;  %v510_v57 = vand.u32 2147483647, %v1120_v63  ;;  %v517_v41 = vmul.f32 %v1199_v29, %v1163_v37 }
  0xc5   :  { %v854_v47 = vpop.eup %853  ;;  %v1210_v38 = vadd.f32 1.0, %v852_v39  ;;  %v584_v51 = vsel %vm583_vm12, %v1132_v49, %v580_v33  ;;  %vm1223_vm14 = vcmp.eq.f32.partialorder %v615_v36, 8.507059e+37  ;;  %v618_v49 = vor.u32 1.1754944e-38, %v617_v30 }
  0xc6   :  { %v856_v60 = vpop.eup %855  ;;  %v599_v35 = vsel %vm598_vm13, %v842_v18, %v595_v55  ;;  %v607_v62 = vmul.f32 %v854_v47, %v1171_v54  ;;  %v589_v26 = vsel %vm1190_vm9, %v588_v42, %v584_v51  ;;  %vm506_vm15 = vweird.f32 %v1120_v63 }
  0xc7   :  { %861 = vrcp.f32 %v1210_v38  ;;  %v1228_v2 = vadd.f32 1.0, %v856_v60  ;;  %v604_v18 = vsel %vm1180_vm7, %v603_v7, %v599_v35  ;;  %vm507_vm0 = vweird.f32 %v1174_v61 }
  0xc8   :  { %v608_v10 = vsub.f32 1.0, %v607_v62  ;;  %v1233_v14 = vpop.eup %857  ;;  %v634_v16 = vmul.f32 %v589_v26, %v1031_v8  ;;  %v504_v17 = vmul.f32 %v1174_v61, %v503_v52  ;;  %vm1237_vm1 = vcmp.eq.f32.partialorder %v510_v57, 8.507059e+37  ;;  %vm1254_vm4 = vmor %vm506_vm15, %vm507_vm0 }
  0xc9   :  { %v512_v25 = vand.u32 2147483648, %v1120_v63  ;;  %vm612_vm2 = vweird.f32 %v854_v47  ;;  %v540_v4 = vand.u32 2147483647, %v1210_v38  ;;  %v518_v7 = vsub.f32 1.0, %v517_v41 }
  0xca   :  { %v860_v50 = vpop.eup %859  ;;  %v609_v28 = vmul.f32 %v854_v47, %v608_v10  ;;  %v635_v30 = vmul.f32 %v604_v18, %v1049_v32  ;;  %v542_v8 = vand.u32 2147483648, %v1210_v38  ;;  %v505_v33 = vadd.f32 %v1174_v61, %v504_v17  ;;  %vm613_vm5 = vmor %vm611_vm11, %vm612_vm2 }
  0xcb   :  { %v1243_v36 = vadd.f32 1.0, %v860_v50  ;;  %863 = vrcp.f32 %v1228_v2  ;;  %vm536_vm3 = vweird.f32 %v1210_v38  ;;  %v519_v42 = vmul.f32 %v1199_v29, %v518_v7 }
  0xcc   :  { %v610_v39 = vadd.f32 %v854_v47, %v609_v28  ;;  %v647_v51 = vpack.c.bf16 %v634_v16, %v633_v23  ;;  %v513_v52 = vor.u32 1.1754944e-38, %v512_v25  ;;  %v525_v57 = vand.u32 2147483647, %v1163_v37 }
  0xcd   :  { %v862_v32 = vpop.eup %861  ;;  %865 = vrcp.f32 %v1243_v36  ;;  %vm1264_vm6 = vcmp.eq.f32.partialorder %v540_v4, 8.507059e+37  ;;  %v557_v62 = vand.u32 2147483648, %v1243_v36  ;;  %v509_v26 = vsel %vm1254_vm4, %v1174_v61, %v505_v33 }
  0xce   :  { %v614_v60 = vsel %vm613_vm5, %v854_v47, %v610_v39  ;;  %v532_v35 = vmul.f32 %v862_v32, %v1210_v38  ;;  %v543_v23 = vor.u32 1.1754944e-38, %v542_v8  ;;  %v555_v41 = vand.u32 2147483647, %v1243_v36 }
  0xcf   :  { %v619_v54 = vsel %vm1223_vm14, %v618_v49, %v614_v60  ;;  %vm522_vm7 = vweird.f32 %v1199_v29  ;;  %v514_v10 = vsel %vm1237_vm1, %v513_v52, %v509_v26  ;;  %v520_v16 = vadd.f32 %v1199_v29, %v519_v42 }
  0xd0   :  { %v636_v47 = vmul.f32 %v619_v54, %v1074_v9  ;;  %v533_v18 = vsub.f32 1.0, %v532_v35  ;;  %vm537_vm8 = vweird.f32 %v862_v32  ;;  %vm521_vm9 = vweird.f32 %v1163_v37 }
  0xd1   :  { %v527_v61 = vand.u32 2147483648, %v1163_v37  ;;  %v472_v6 = vmul.f32 %v1114_v59, %v1066_v1  ;;  %v1284_v49 = vpop.eup %863  ;;  %vm551_vm10 = vweird.f32 %v1243_v36  ;;  %v558_v9 = vor.u32 1.1754944e-38, %v557_v62  ;;  %vm1287_vm11 = vmor %vm521_vm9, %vm522_vm7 }
  0xd2   :  { %v648_v17 = vpack.c.bf16 %v636_v47, %v635_v30  ;;  %v534_v25 = vmul.f32 %v862_v32, %v533_v18  ;;  %vm1291_vm12 = vcmp.eq.f32.partialorder %v525_v57, 8.507059e+37  ;;  %v524_v37 = vsel %vm1287_vm11, %v1199_v29, %v520_v16  ;;  %vm538_vm14 = vmor %vm536_vm3, %vm537_vm8 }
  0xd3   :  { %v866_v28 = vpop.eup %865  ;;  %v1299_v4 = vmul.f32 %v514_v10, %v1046_v27  ;;  %v473_v7 = vsub.f32 1.0, %v472_v6  ;;  %v480_v30 = vand.u32 2147483647, %v1066_v1  ;;  %vm1303_vm13 = vcmp.eq.f32.partialorder %v555_v41, 8.507059e+37 }
  0xd4   :  { %685 = vmatpush.bf16.msra.mxu1 %v648_v17  ;;  %791 = vmatpush.bf16.msrb.mxu3 %v648_v17  ;;  %v535_v8 = vadd.f32 %v862_v32, %v534_v25  ;;  %v547_v33 = vmul.f32 %v866_v28, %v1243_v36  ;;  %v482_v55 = vand.u32 2147483648, %v1066_v1  ;;  %v487_v29 = vmul.f32 %v1128_v12, %v1087_v40 }
  0xd5   :  { %v528_v27 = vor.u32 1.1754944e-38, %v527_v61  ;;  %v474_v42 = vmul.f32 %v1114_v59, %v473_v7  ;;  %vm476_vm15 = vweird.f32 %v1066_v1  ;;  %vm477_vm0 = vweird.f32 %v1114_v59 }
  0xd6   :  { %v539_v52 = vsel %vm538_vm14, %v862_v32, %v535_v8  ;;  %v548_v57 = vsub.f32 1.0, %v547_v33  ;;  %vm552_vm1 = vweird.f32 %v866_v28  ;;  %v488_v60 = vsub.f32 1.0, %v487_v29  ;;  %vm478_vm3 = vmor %vm476_vm15, %vm477_vm0 }
  0xd7   :  { %v544_v35 = vsel %vm1264_vm6, %v543_v23, %v539_v52  ;;  %v529_v62 = vsel %vm1291_vm12, %v528_v27, %v524_v37  ;;  %v475_v38 = vadd.f32 %v1114_v59, %v474_v42  ;;  %vm1321_vm2 = vcmp.eq.f32.partialorder %v480_v30, 8.507059e+37  ;;  %vm553_vm6 = vmor %vm551_vm10, %vm552_vm1 }
  0xd8   :  { %686 = vmatpush.bf16.msra.mxu1 %v647_v51  ;;  %792 = vmatpush.bf16.msrb.mxu3 %v647_v51  ;;  %v549_v1 = vmul.f32 %v866_v28, %v548_v57  ;;  %v483_v32 = vor.u32 1.1754944e-38, %v482_v55  ;;  %vm492_vm4 = vweird.f32 %v1128_v12  ;;  %v495_v54 = vand.u32 2147483647, %v1087_v40 }
  0xd9   :  { %v479_v63 = vsel %vm478_vm3, %v1114_v59, %v475_v38  ;;  %v489_v23 = vmul.f32 %v1128_v12, %v488_v60  ;;  %v497_v41 = vand.u32 2147483648, %v1087_v40  ;;  %v442_v47 = vmul.f32 %v1233_v14, %v1185_v13 }
  0xda   :  { %v550_v18 = vadd.f32 %v866_v28, %v549_v1  ;;  %v631_v10 = vmul.f32 %v544_v35, %v1107_v48  ;;  %v630_v51 = vmul.f32 %v529_v62, %v1070_v3  ;;  %vm491_vm5 = vweird.f32 %v1087_v40 }
  0xdb   :  { %v484_v59 = vsel %vm1321_vm2, %v483_v32, %v479_v63  ;;  %v490_v16 = vadd.f32 %v1128_v12, %v489_v23  ;;  %vm496_vm7 = vcmp.eq.f32.partialorder %v495_v54, 8.507059e+37  ;;  %v443_v61 = vsub.f32 1.0, %v442_v47  ;;  %vm493_vm8 = vmor %vm491_vm5, %vm492_vm4 }
  0xdc   :  { %v554_v6 = vsel %vm553_vm6, %v866_v28, %v550_v18  ;;  %v498_v48 = vor.u32 1.1754944e-38, %v497_v41  ;;  %vm447_vm9 = vweird.f32 %v1233_v14  ;;  %v452_v3 = vand.u32 2147483648, %v1185_v13 }
  0xdd   :  { %v559_v40 = vsel %vm1303_vm13, %v558_v9, %v554_v6  ;;  %v494_v36 = vsel %vm493_vm8, %v1128_v12, %v490_v16  ;;  %v444_v17 = vmul.f32 %v1233_v14, %v443_v61  ;;  %v457_v25 = vmul.f32 %v1284_v49, %v1228_v2 }
  0xde   :  { %v632_v21 = vmul.f32 %v559_v40, %v1140_v22  ;;  %v499_v50 = vsel %vm496_vm7, %v498_v48, %v494_v36  ;;  %vm446_vm10 = vweird.f32 %v1185_v13  ;;  %v450_v28 = vand.u32 2147483647, %v1185_v13 }
  0xdf   :  { %v627_v37 = vmul.f32 %v484_v59, %v1016_v53  ;;  %v628_v7 = vmul.f32 %v499_v50, %v1028_v5  ;;  %v445_v9 = vadd.f32 %v1233_v14, %v444_v17  ;;  %v458_v30 = vsub.f32 1.0, %v457_v25  ;;  %vm448_vm11 = vmor %vm446_vm10, %vm447_vm9 }
  0xe0   :  { %v646_v12 = vpack.c.bf16 %v632_v21, %v631_v10  ;;  %v453_v8 = vor.u32 1.1754944e-38, %v452_v3  ;;  %v465_v33 = vand.u32 2147483647, %v1228_v2  ;;  %v467_v22 = vand.u32 2147483648, %v1228_v2 }
  0xe1   :  { %v449_v39 = vsel %vm448_vm11, %v1233_v14, %v445_v9  ;;  %v459_v13 = vmul.f32 %v1284_v49, %v458_v30  ;;  %vm462_vm12 = vweird.f32 %v1284_v49  ;;  %v412_v53 = vmul.f32 %v1142_v0, %v1096_v31 }
  0xe2   :  { %687 = vmatpush.bf16.msra.mxu1 %v646_v12  ;;  %793 = vmatpush.bf16.msrb.mxu3 %v646_v12  ;;  %v645_v5 = vpack.c.bf16 %v630_v51, %v1299_v4  ;;  %v644_v55 = vpack.c.bf16 %v628_v7, %v627_v37  ;;  %vm451_vm13 = vcmp.eq.f32.partialorder %v450_v28, 8.507059e+37  ;;  %vm461_vm14 = vweird.f32 %v1228_v2 }
  0xe3   :  { %v454_v29 = vsel %vm451_vm13, %v453_v8, %v449_v39  ;;  %v460_v27 = vadd.f32 %v1284_v49, %v459_v13  ;;  %vm466_vm15 = vcmp.eq.f32.partialorder %v465_v33, 8.507059e+37  ;;  %v413_v14 = vsub.f32 1.0, %v412_v53  ;;  %vm463_vm0 = vmor %vm461_vm14, %vm462_vm12 }
  0xe4   :  { %v468_v42 = vor.u32 1.1754944e-38, %v467_v22  ;;  %vm416_vm1 = vweird.f32 %v1096_v31  ;;  %v422_v52 = vand.u32 2147483648, %v1096_v31  ;;  %v427_v57 = vmul.f32 %v1195_v24, %v1137_v20  ;;  %v661_v22 = vpop.permute.xlu2 %660 }
  0xe5   :  { %v464_v4 = vsel %vm463_vm0, %v1284_v49, %v460_v27  ;;  %v414_v60 = vmul.f32 %v1142_v0, %v413_v14  ;;  %vm417_vm2 = vweird.f32 %v1142_v0  ;;  %v420_v2 = vand.u32 2147483647, %v1096_v31 }
  0xe6   :  { %688 = vmatpush.bf16.msra.mxu1 %v645_v5  ;;  %794 = vmatpush.bf16.msrb.mxu3 %v645_v5  ;;  %v469_v35 = vsel %vm466_vm15, %v468_v42, %v464_v4  ;;  %v625_v62 = vmul.f32 %v454_v29, %v1079_v15  ;;  %v428_v38 = vsub.f32 1.0, %v427_v57  ;;  %vm431_vm3 = vweird.f32 %v1137_v20  ;;  %vm418_vm5 = vmor %vm416_vm1, %vm417_vm2 }
  0xe7   :  { %v415_v26 = vadd.f32 %v1142_v0, %v414_v60  ;;  %vm432_vm4 = vweird.f32 %v1195_v24  ;;  %v435_v49 = vand.u32 2147483647, %v1137_v20  ;;  %v437_v1 = vand.u32 2147483648, %v1137_v20 }
  0xe8   :  { %v626_v32 = vmul.f32 %v469_v35, %v1111_v56  ;;  %v423_v54 = vor.u32 1.1754944e-38, %v422_v52  ;;  %v429_v63 = vmul.f32 %v1195_v24, %v428_v38  ;;  %v382_v15 = vmul.f32 %v1100_v45, %v1063_v58  ;;  %vm433_vm9 = vmor %vm431_vm3, %vm432_vm4 }
  0xe9   :  { %v419_v23 = vsel %vm418_vm5, %v1142_v0, %v415_v26  ;;  %vm421_vm6 = vcmp.eq.f32.partialorder %v420_v2, 8.507059e+37  ;;  %vm386_vm7 = vweird.f32 %v1063_v58  ;;  %vm387_vm8 = vweird.f32 %v1100_v45 }
  0xea   :  { %689 = vmatpush.bf16.msra.mxu1 %v644_v55  ;;  %795 = vmatpush.bf16.msrb.mxu3 %v644_v55  ;;  %v424_v41 = vsel %vm421_vm6, %v423_v54, %v419_v23  ;;  %v430_v56 = vadd.f32 %v1195_v24, %v429_v63  ;;  %v383_v31 = vsub.f32 1.0, %v382_v15  ;;  %v392_v47 = vand.u32 2147483648, %v1063_v58  ;;  %vm1408_vm11 = vmor %vm386_vm7, %vm387_vm8 }
  0xeb   :  { %v438_v18 = vor.u32 1.1754944e-38, %v437_v1  ;;  %v390_v0 = vand.u32 2147483647, %v1063_v58  ;;  %v397_v10 = vmul.f32 %v1161_v34, %v1103_v43  ;;  %v643_v51 = vpack.c.bf16 %v626_v32, %v625_v62 }
  0xec   :  { %v434_v59 = vsel %vm433_vm9, %v1195_v24, %v430_v56  ;;  %vm436_vm10 = vcmp.eq.f32.partialorder %v435_v49, 8.507059e+37  ;;  %v384_v16 = vmul.f32 %v1100_v45, %v383_v31  ;;  %v623_v6 = vmul.f32 %v424_v41, %v1035_v11 }
  0xed   :  { %v439_v61 = vsel %vm436_vm10, %v438_v18, %v434_v59  ;;  %v398_v48 = vsub.f32 1.0, %v397_v10  ;;  %v393_v40 = vor.u32 1.1754944e-38, %v392_v47  ;;  %v407_v36 = vand.u32 2147483648, %v1103_v43 }
  0xee   :  { %690 = vmatpush.bf16.msra.mxu1 %v643_v51  ;;  %796 = vmatpush.bf16.msrb.mxu3 %v643_v51  ;;  %v624_v3 = vmul.f32 %v439_v61, %v1054_v44  ;;  %v385_v24 = vadd.f32 %v1100_v45, %v384_v16  ;;  %vm391_vm12 = vcmp.eq.f32.partialorder %v390_v0, 8.507059e+37  ;;  %vm402_vm13 = vweird.f32 %v1161_v34 }
  0xef   :  { %v399_v11 = vmul.f32 %v1161_v34, %v398_v48  ;;  %v405_v58 = vand.u32 2147483647, %v1103_v43  ;;  %vm401_vm14 = vweird.f32 %v1103_v43  ;;  %v408_v50 = vor.u32 1.1754944e-38, %v407_v36  ;;  %v786_v43 = vld [vmem:[%s1448_s3 + $0x8] sm:$0xff] }
  0xf0   :  { %v642_v17 = vpack.c.bf16 %v624_v3, %v623_v6  ;;  %v389_v25 = vsel %vm1408_vm11, %v1100_v45, %v385_v24  ;;  %vm403_vm15 = vmor %vm401_vm14, %vm402_vm13  ;;  %v785_v45 = vld [vmem:[%s1448_s3] sm:$0xff]  ;;  %vm704_vm1 = vcmask 130048  }
  0xf1   :  { %v400_v21 = vadd.f32 %v1161_v34, %v399_v11  ;;  %v394_v44 = vsel %vm391_vm12, %v393_v40, %v389_v25  ;;  %vm406_vm0 = vcmp.eq.f32.partialorder %v405_v58, 8.507059e+37 }
  0xf2   :  { %691 = vmatpush.bf16.msra.mxu1 %v642_v17  ;;  %797 = vmatpush.bf16.msrb.mxu3 %v642_v17  ;;  %v621_v7 = vmul.f32 %v394_v44, %v1010_v46  ;;  %v666_v46 = vpop.permute.xlu0 %665 }
  0xf3   :  { %v404_v28 = vsel %vm403_vm15, %v1161_v34, %v400_v21  ;;  %v656_v34 = vpop.permute.xlu1 %655 }
  0xf4   :  { %v409_v37 = vsel %vm406_vm0, %v408_v50, %v404_v28 }
  0xf5   :  { %v622_v9 = vmul.f32 %v409_v37, %v1041_v19 }
  0xf7   :  { %v641_v30 = vpack.c.bf16 %v622_v9, %v621_v7 }
  0xf9   :  { %692 = vmatpush.bf16.msra.mxu1 %v641_v30  ;;  %798 = vmatpush.bf16.msrb.mxu3 %v641_v30 }
  0xfb   :  { %v671_v53 = vpop.permute.xlu1 %670 }
  0xfc   :  { %693 = vmatmul.bf16.vlgmr.msra.gmra.mxu1 %v785_v45  ;;  %698 = vmatmul.bf16.vlgmr.msrb.gmra.mxu3 %v786_v43 }
 0x179   :  { %v694_v12 = vpop.f32.mrf.mxu1 }
 0x17a   :  { %v695_v8 = vadd.f32 %v694_v12, %v656_v34 }
 0x17c   :  { %705 = vst.msk [vmem:[%s1449_s5] sm:$0xff] %vm704_vm1, %v695_v8 }
 0x17f   :  { %v699_v19 = vpop.f32.mrf.mxu3 }
 0x180   :  { %v700_v33 = vadd.f32 %v699_v19, %v666_v46 }
 0x181   :  { %v696_v39 = vpop.f32.mrf.mxu1 }
 0x182   :  { %707 = vst.msk [vmem:[%s1449_s5 + $0x10] sm:$0xff] %vm704_vm1, %v700_v33  ;;  %v697_v13 = vadd.f32 %v696_v39, %v661_v22 }
 0x184   :  { %706 = vst.msk [vmem:[%s1449_s5 + $0x8] sm:$0xff] %vm704_vm1, %v697_v13 }
 0x187   :  { %v701_v5 = vpop.f32.mrf.mxu3 }
 0x188   :  { %v702_v55 = vadd.f32 %v701_v5, %v671_v53 }
 0x18a   :  { %708 = vst.msk [vmem:[%s1449_s5 + $0x18] sm:$0xff] %vm704_vm1, %v702_v55 }

</bundles_post_ra>
